<compile_context>
chip_gen: v7x
topology: tpu7x:2x2x1
jax: 0.10.0
libtpu: 0.0.40
codegen_flags: <defaults>
</compile_context>

<pallas_src>
import math

import jax
import jax.numpy as jnp
from jax.experimental import pallas as pl
from jax.experimental.pallas import tpu as pltpu


_LOG_EPS = math.log(1e-8)     # reference epsilon:  alpha / (sum(alpha) + 1e-8)
_EXP_CLAMP = 80.0             # keeps the rescaled epsilon finite in f32 for any score


def _round_up(n, m):
    return (n + m - 1) // m * m


def _vmem_capacity_bytes():
    # Generation-aware VMEM sizing (v5e/v6e: 128 MiB per core, v7x: 64 MiB per core).
    try:
        return int(pltpu.get_tpu_info().vmem_capacity_bytes)
    except Exception:  # query unavailable (e.g. interpret mode) -> assume smallest (v7x)
        return 64 * 1024 * 1024


def _pad_cast(a, shape, dtype):
    """Cast / zero-pad only when actually needed, so aligned inputs avoid an HBM copy."""
    if a.dtype != dtype:
        a = a.astype(dtype)
    if tuple(a.shape) != tuple(shape):
        a = jnp.pad(a, [(0, t - s) for s, t in zip(a.shape, shape)])
    return a


def _attn_pool_kernel(x_ref, mask_ref, w1_ref, b1_ref, w2_ref, b2_ref,
                      out_ref, acc_ref, denom_ref, m_ref):
    # x_ref:   (TB, TS, Dp)   mask_ref: (TB, TS)      w1_ref: (Dp, Hp)
    # b1_ref:  (1, Hp)        w2_ref:   (Hp, 1)       b2_ref: (1, 1) in SMEM
    # out_ref: (TB, Dp)
    # scratch: acc (TB, Dp) f32, denom (TB, 1) f32, m (TB, 1) f32 running max
    k = pl.program_id(1)
    ns = pl.num_programs(1)

    @pl.when(k == 0)
    def _init():
        acc_ref[...] = jnp.zeros_like(acc_ref)
        denom_ref[...] = jnp.zeros_like(denom_ref)
        m_ref[...] = jnp.full(m_ref.shape, -jnp.inf, m_ref.dtype)

    tb, ts, dp = x_ref.shape
    x = x_ref[...]                                   # (TB, TS, Dp) compute dtype
    xm = x.reshape(tb * ts, dp)                      # tile-aligned merge (TS%8==0, Dp%128==0)

    # fc1 -> tanh : one large MXU matmul over TB*TS rows, f32 accumulation.
    e = jnp.tanh(
        jnp.dot(xm, w1_ref[...], preferred_element_type=jnp.float32) + b1_ref[...]
    )                                                # (TB*TS, Hp) f32

    # fc2 (output dim 1) as an MXU dot against the (Hp, 1) column; b2 from SMEM.
    score = (
        jnp.dot(e, w2_ref[...], preferred_element_type=jnp.float32) + b2_ref[0, 0]
    )                                                # (TB*TS, 1) f32

    # The ONE sublane->lane relayout: bring scores lane-major.  For multi-tile sequences
    # TS is a multiple of 128, so this is tile-aligned.
    score2 = score.reshape(tb, ts)                   # (TB, TS) lane-major
    mask2 = mask_ref[...]                            # (TB, TS) lane-major, f32

    # Online max / exp (algebraically identical to the unstabilized reference).
    m_prev = m_ref[...]                              # (TB, 1)
    m_new = jnp.maximum(m_prev, jnp.max(score2, axis=-1, keepdims=True))
    corr = jnp.exp(m_prev - m_new)                   # (TB, 1)
    alpha = jnp.exp(score2 - m_new) * mask2          # (TB, TS) f32

    # Weighted partial sum on the MXU: (TB,1,TS) @ (TB,TS,Dp) -> (TB,1,Dp).
    part = jnp.einsum(
        "bqs,bsd->bqd", alpha.reshape(tb, 1, ts).astype(x.dtype), x,
        preferred_element_type=jnp.float32,
    ).reshape(tb, dp)

    acc_ref[...] = acc_ref[...] * corr + part
    denom_ref[...] = denom_ref[...] * corr + jnp.sum(alpha, axis=-1, keepdims=True)
    m_ref[...] = m_new

    @pl.when(k == ns - 1)
    def _finalize():
        # sum(exp(s)) + 1e-8 == exp(m) * (denom + exp(log(1e-8) - m)).  The clamp keeps
        # the rescaled epsilon finite (no +inf) even for extremely negative running max;
        # in that regime both kernel and reference are ~0.
        eps = jnp.exp(jnp.minimum(_LOG_EPS - m_ref[...], _EXP_CLAMP))
        out_ref[...] = (acc_ref[...] / (denom_ref[...] + eps)).astype(out_ref.dtype)


def attention_pooling(x, w1, b1, w2, b2, attn_mask=None, *,
                      compute_dtype=jnp.bfloat16, batch_tile=8, max_seq_tile=None):
    """x: (B, S, D); w1: (D, H); b1: (H,); w2: (H,); b2: scalar -> (B, D)."""
    B, S, D = x.shape
    H = w1.shape[1]
    out_dtype = x.dtype
    cdt = jnp.dtype(compute_dtype) if compute_dtype is not None else jnp.dtype(x.dtype)

    # Lane-dense feature dims (zero-padded W1 rows/cols keep the math exact).
    Dp = _round_up(D, 128)
    Hp = _round_up(H, 128)

    # Batch tile.  Keep >=2 batch tiles when B >= 16 so the "parallel" grid axis can
    # split across v7x's two TensorCores (v5e/v6e are single-TC; harmless there).
    TB = max(8, _round_up(batch_tile, 8))
    TB = min(TB, _round_up(B, 8))
    if B >= 16:
        TB = min(TB, _round_up(_round_up(B, 16) // 2, 8))
    Bp = _round_up(B, TB)

    # Sequence tile: a multiple of 128 for long sequences (tile-aligned score relayout,
    # lane-dense mask / einsum), a single 8-aligned tile for short ones (avoids blowing
    # up padding for tiny S).  Sized from a generation-aware VMEM budget.
    vmem_cap = _vmem_capacity_bytes()
    big_vmem = vmem_cap > (96 << 20)                       # v5e / v6e (128 MiB parts)
    if max_seq_tile is None:
        max_seq_tile = 2048 if big_vmem else 1024          # v7x (64 MiB) -> smaller tiles
    budget = (48 << 20) if big_vmem else (24 << 20)

    x_isz = cdt.itemsize
    per_row = TB * (2 * Dp * x_isz + 2 * 4 + Hp * 4)       # x (2-buf) + mask (2-buf) + e
    if S > 128:
        ts_cap = max(128, (budget // max(per_row, 1)) // 128 * 128)
        TS = min(_round_up(S, 128), max(128, _round_up(max_seq_tile, 128)), ts_cap)
    else:
        TS = _round_up(S, 8)
    Sp = _round_up(S, TS)

    # Operands: pad / cast only when actually required.  Fully aligned inputs in the
    # compute dtype pass straight through with no extra HBM copy.
    xp = _pad_cast(x, (Bp, Sp, Dp), cdt)
    if attn_mask is None:
        if (Bp, Sp) == (B, S):
            maskp = jnp.ones((B, S), jnp.float32)
        else:
            maskp = jnp.zeros((Bp, Sp), jnp.float32).at[:B, :S].set(1.0)
    else:
        maskp = _pad_cast(attn_mask, (Bp, Sp), jnp.float32)
    w1p = _pad_cast(w1, (Dp, Hp), cdt)
    b1p = _pad_cast(b1.reshape(1, H), (1, Hp), jnp.float32)
    w2p = _pad_cast(w2.reshape(H, 1), (Hp, 1), jnp.float32)
    b2p = jnp.asarray(b2, jnp.float32).reshape(1, 1)

    grid = (Bp // TB, Sp // TS)

    # VMEM actually used: x/mask/out double buffers, resident weights (2 bufs worst
    # case), scratch, and the fc1 'e' temporary counted once (not twice).
    out_isz = jnp.dtype(out_dtype).itemsize
    est = (2 * TB * TS * Dp * x_isz            # x double buffer
           + 2 * TB * TS * 4                   # mask double buffer
           + 2 * (Dp * Hp * x_isz + 2 * Hp * 4)  # W1 / b1 / w2
           + 2 * TB * Dp * out_isz             # out double buffer
           + TB * (Dp + 2) * 4                 # acc / denom / m scratch
           + TB * TS * Hp * 4                  # fc1 'e' temporary (once)
           + 2 * TB * TS * 4)                  # score / alpha temporaries
    # Keep ~15% headroom below physical VMEM (matters on v7x's 64 MiB).
    vmem_limit = int(min(max(est * 5 // 4 + (4 << 20), 16 << 20),
                         vmem_cap * 85 // 100))

    out = pl.pallas_call(
        _attn_pool_kernel,
        out_shape=jax.ShapeDtypeStruct((Bp, Dp), out_dtype),
        grid_spec=pltpu.PrefetchScalarGridSpec(
            num_scalar_prefetch=0,
            grid=grid,
            in_specs=[
                pl.BlockSpec((TB, TS, Dp), lambda b, k: (b, k, 0)),   # x
                pl.BlockSpec((TB, TS), lambda b, k: (b, k)),          # mask (lane-dense)
                pl.BlockSpec((Dp, Hp), lambda b, k: (0, 0)),          # W1 (resident)
                pl.BlockSpec((1, Hp), lambda b, k: (0, 0)),           # b1
                pl.BlockSpec((Hp, 1), lambda b, k: (0, 0)),           # W2 column
                pl.BlockSpec(memory_space=pltpu.MemorySpace.SMEM),    # b2 scalar in SMEM
            ],
            out_specs=pl.BlockSpec((TB, Dp), lambda b, k: (b, 0)),
            scratch_shapes=[
                pltpu.VMEM((TB, Dp), jnp.float32),   # acc
                pltpu.VMEM((TB, 1), jnp.float32),    # denom
                pltpu.VMEM((TB, 1), jnp.float32),    # running max
            ],
        ),
        compiler_params=pltpu.CompilerParams(
            dimension_semantics=("parallel", "arbitrary"),
            vmem_limit_bytes=vmem_limit,
        ),
    )(xp, maskp, w1p, b1p, w2p, b2p)

    if (Bp, Dp) != (B, D):
        out = out[:B, :D]
    return out


def reference(x, w1, b1, w2, b2, attn_mask=None):
    # Pure-JAX reference mirroring the PyTorch forward (full-precision matmuls).
    hp = jax.lax.Precision.HIGHEST
    e = jnp.tanh(jnp.einsum("bsd,dh->bsh", x, w1, precision=hp) + b1)
    alpha = jnp.exp(jnp.einsum("bsh,h->bs", e, w2, precision=hp) + b2)[..., None]
    if attn_mask is not None:
        alpha = alpha * attn_mask[..., None]
    alpha = alpha / (jnp.sum(alpha, axis=1, keepdims=True) + 1e-8)
    return jnp.einsum("bsd,bsk->bdk", x, alpha, precision=hp).reshape(x.shape[0], -1)


if __name__ == "__main__":
    key = jax.random.PRNGKey(0)
    initializer_range = 0.02

    # ---- case 1: small shapes, f32 streams, with mask (exercises D/H/B padding) -----
    B, S, D, H = 2, 8, 32, 32
    k1, k2, k3, k4, key = jax.random.split(key, 5)
    x = jax.random.normal(k1, (B, S, D), dtype=jnp.float32)
    attn_mask = (jax.random.uniform(k2, (B, S)) > 0.2).astype(jnp.float32)
    w1 = initializer_range * jax.random.normal(k3, (D, H), dtype=jnp.float32)
    b1 = jnp.zeros((H,), jnp.float32)
    w2 = initializer_range * jax.random.normal(k4, (H,), dtype=jnp.float32)
    b2 = jnp.float32(0.0)

    out = jax.block_until_ready(
        attention_pooling(x, w1, b1, w2, b2, attn_mask, compute_dtype=jnp.float32))
    ref = reference(x, w1, b1, w2, b2, attn_mask)
    assert out.shape == (B, D)
    # Tolerances account for TPU matmul precision modes (MXU bf16 passes) on either side.
    assert jnp.allclose(out, ref, atol=5e-3, rtol=5e-3), (
        f"case1 max abs err {float(jnp.max(jnp.abs(out - ref)))}")

    # ---- case 2: odd shapes, several sequence tiles (online accumulation + padding) --
    B2, S2, D2, H2 = 3, 300, 40, 48
    k1, k2, k3, k4, key = jax.random.split(key, 5)
    x2 = jax.random.normal(k1, (B2, S2, D2), dtype=jnp.float32)
    w1_2 = initializer_range * jax.random.normal(k2, (D2, H2), dtype=jnp.float32)
    b1_2 = 0.1 * jax.random.normal(k3, (H2,), dtype=jnp.float32)
    w2_2 = initializer_range * jax.random.normal(k4, (H2,), dtype=jnp.float32)
    b2_2 = jnp.float32(0.05)

    out2 = jax.block_until_ready(
        attention_pooling(x2, w1_2, b1_2, w2_2, b2_2, None,
                          compute_dtype=jnp.float32, max_seq_tile=128))
    ref2 = reference(x2, w1_2, b1_2, w2_2, b2_2, None)
    assert out2.shape == (B2, D2)
    assert jnp.allclose(out2, ref2, atol=5e-3, rtol=5e-3), (
        f"case2 max abs err {float(jnp.max(jnp.abs(out2 - ref2)))}")

    # ---- case 3: default bf16 x/W1 streams on the case-1 problem --------------------
    out3 = jax.block_until_ready(attention_pooling(x, w1, b1, w2, b2, attn_mask))
    assert jnp.allclose(out3, ref, atol=2e-2, rtol=2e-2), (
        f"case3 max abs err {float(jnp.max(jnp.abs(out3 - ref)))}")

    # ---- case 4: fully aligned shapes + bf16 input: zero wrapper copies path ---------
    B4, S4, D4, H4 = 8, 256, 128, 128
    k1, k2, k3, k4, key = jax.random.split(key, 5)
    x4 = jax.random.normal(k1, (B4, S4, D4), dtype=jnp.bfloat16)
    mask4 = (jax.random.uniform(k2, (B4, S4)) > 0.2).astype(jnp.float32)
    w1_4 = initializer_range * jax.random.normal(k3, (D4, H4), dtype=jnp.float32)
    b1_4 = jnp.zeros((H4,), jnp.float32)
    w2_4 = initializer_range * jax.random.normal(k4, (H4,), dtype=jnp.float32)
    b2_4 = jnp.float32(0.0)

    out4 = jax.block_until_ready(
        attention_pooling(x4, w1_4, b1_4, w2_4, b2_4, mask4))
    ref4 = reference(x4.astype(jnp.float32), w1_4, b1_4, w2_4, b2_4, mask4)
    assert out4.shape == (B4, D4)
    assert jnp.allclose(out4.astype(jnp.float32), ref4, atol=2e-2, rtol=2e-2), (
        f"case4 max abs err {float(jnp.max(jnp.abs(out4.astype(jnp.float32) - ref4)))}")

    print("KERNEL_OK")
</pallas_src>

<mosaic_0001>
module attributes {stable_mosaic.version = 11 : i64} {
  func.func @_attn_pool_kernel(%arg0: i32, %arg1: i32, %arg2: memref<8x8x128xf32, #tpu.memory_space<vmem>>, %arg3: memref<8x8xf32, #tpu.memory_space<vmem>>, %arg4: memref<128x128xf32, #tpu.memory_space<vmem>>, %arg5: memref<1x128xf32, #tpu.memory_space<vmem>>, %arg6: memref<128x1xf32, #tpu.memory_space<vmem>>, %arg7: memref<1x1xf32, #tpu.memory_space<smem>>, %arg8: memref<8x128xf32, #tpu.memory_space<vmem>>, %arg9: memref<8x128xf32, #tpu.memory_space<vmem>>, %arg10: memref<8x1xf32, #tpu.memory_space<vmem>>, %arg11: memref<8x1xf32, #tpu.memory_space<vmem>>) attributes {dimension_semantics = [#tpu.dimension_semantics<parallel>, #tpu.dimension_semantics<arbitrary>], iteration_bounds = array<i64: 1, 1>, scalar_prefetch = 0 : i64, scratch_operands = 3 : i64, tpu.core_type = #tpu.core_type<tc>, window_params = [{transform_indices = @transform_0, window_bounds = array<i64: 8, 8, 128>}, {transform_indices = @transform_1, window_bounds = array<i64: 8, 8>}, {pipeline_mode = #tpu.pipeline_mode<synchronous>, transform_indices = @transform_2, window_bounds = array<i64: 128, 128>}, {pipeline_mode = #tpu.pipeline_mode<synchronous>, transform_indices = @transform_3, window_bounds = array<i64: 1, 128>}, {pipeline_mode = #tpu.pipeline_mode<synchronous>, transform_indices = @transform_4, window_bounds = array<i64: 128, 1>}, {transform_indices = @transform_5, window_bounds = array<i64: 1, 1>}, {transform_indices = @transform_6, window_bounds = array<i64: 8, 128>}]} {
    %c0_i32 = arith.constant 0 : i32
    %0 = arith.cmpi eq, %arg1, %c0_i32 : i32
    %1 = arith.extui %0 : i1 to i32
    %c0_i32_0 = arith.constant 0 : i32
    %2 = arith.cmpi ne, %1, %c0_i32_0 : i32
    scf.if %2 {
      %cst_31 = arith.constant 0.000000e+00 : f32
      %46 = vector.broadcast %cst_31 : f32 to vector<8x128xf32>
      %c0_32 = arith.constant 0 : index
      %c0_33 = arith.constant 0 : index
      %47 = vector.load %arg9[%c0_32, %c0_33] : memref<8x128xf32, #tpu.memory_space<vmem>>, vector<8x128xf32>
      tpu.vector_store %arg9[%c0_32, %c0_33], %46 {strides = array<i32>} : memref<8x128xf32, #tpu.memory_space<vmem>>, vector<8x128xf32>,
      %cst_34 = arith.constant 0.000000e+00 : f32
      %48 = vector.broadcast %cst_34 : f32 to vector<8x1xf32>
      %c0_35 = arith.constant 0 : index
      %c0_36 = arith.constant 0 : index
      %49 = vector.load %arg10[%c0_35, %c0_36] : memref<8x1xf32, #tpu.memory_space<vmem>>, vector<8x1xf32>
      tpu.vector_store %arg10[%c0_35, %c0_36], %48 {strides = array<i32>} : memref<8x1xf32, #tpu.memory_space<vmem>>, vector<8x1xf32>,
      %cst_37 = arith.constant 0xFF800000 : f32
      %50 = vector.broadcast %cst_37 : f32 to vector<8x1xf32>
      %c0_38 = arith.constant 0 : index
      %c0_39 = arith.constant 0 : index
      %51 = vector.load %arg11[%c0_38, %c0_39] : memref<8x1xf32, #tpu.memory_space<vmem>>, vector<8x1xf32>
      tpu.vector_store %arg11[%c0_38, %c0_39], %50 {strides = array<i32>} : memref<8x1xf32, #tpu.memory_space<vmem>>, vector<8x1xf32>,
    } else {
    }
    %c0 = arith.constant 0 : index
    %c0_1 = arith.constant 0 : index
    %c0_2 = arith.constant 0 : index
    %3 = vector.load %arg2[%c0, %c0_1, %c0_2] : memref<8x8x128xf32, #tpu.memory_space<vmem>>, vector<8x8x128xf32>
    %4 = vector.shape_cast %3 : vector<8x8x128xf32> to vector<64x128xf32>
    %c0_3 = arith.constant 0 : index
    %c0_4 = arith.constant 0 : index
    %5 = vector.load %arg4[%c0_3, %c0_4] : memref<128x128xf32, #tpu.memory_space<vmem>>, vector<128x128xf32>
    %cst = arith.constant dense<0.000000e+00> : vector<64x128xf32>
    %6 = tpu.matmul %4, %5, %cst {dimension_numbers = #tpu.dot_dimension_numbers<[1], [0], [0], [1], [0, 0, 1, 1], [], []>} : vector<64x128xf32>, vector<128x128xf32>, vector<64x128xf32> -> vector<64x128xf32>
    %c0_5 = arith.constant 0 : index
    %c0_6 = arith.constant 0 : index
    %7 = vector.load %arg5[%c0_5, %c0_6] : memref<1x128xf32, #tpu.memory_space<vmem>>, vector<1x128xf32>
    %8 = vector.broadcast %7 : vector<1x128xf32> to vector<64x128xf32>
    %9 = arith.addf %6, %8 : vector<64x128xf32>
    %10 = math.tanh %9 : vector<64x128xf32>
    %c0_7 = arith.constant 0 : index
    %c0_8 = arith.constant 0 : index
    %11 = vector.load %arg6[%c0_7, %c0_8] : memref<128x1xf32, #tpu.memory_space<vmem>>, vector<128x1xf32>
    %cst_9 = arith.constant dense<0.000000e+00> : vector<64x1xf32>
    %12 = tpu.matmul %10, %11, %cst_9 {dimension_numbers = #tpu.dot_dimension_numbers<[1], [0], [0], [1], [0, 0, 1, 1], [], []>} : vector<64x128xf32>, vector<128x1xf32>, vector<64x1xf32> -> vector<64x1xf32>
    %c0_10 = arith.constant 0 : index
    %c0_11 = arith.constant 0 : index
    %13 = memref.load %arg7[%c0_10, %c0_11] : memref<1x1xf32, #tpu.memory_space<smem>>
    %14 = vector.broadcast %13 : f32 to vector<64x1xf32>
    %15 = arith.addf %12, %14 : vector<64x1xf32>
    %16 = vector.shape_cast %15 : vector<64x1xf32> to vector<8x8xf32>
    %c0_12 = arith.constant 0 : index
    %c0_13 = arith.constant 0 : index
    %17 = vector.load %arg3[%c0_12, %c0_13] : memref<8x8xf32, #tpu.memory_space<vmem>>, vector<8x8xf32>
    %c0_14 = arith.constant 0 : index
    %c0_15 = arith.constant 0 : index
    %18 = vector.load %arg11[%c0_14, %c0_15] : memref<8x1xf32, #tpu.memory_space<vmem>>, vector<8x1xf32>
    %cst_16 = arith.constant dense<0xFF800000> : vector<8xf32>
    %19 = vector.multi_reduction <maximumf>, %16, %cst_16 [1] : vector<8x8xf32> to vector<8xf32>
    %20 = vector.shape_cast %19 : vector<8xf32> to vector<8x1xf32>
    %21 = arith.maximumf %18, %20 : vector<8x1xf32>
    %22 = arith.subf %18, %21 : vector<8x1xf32>
    %23 = math.exp %22 : vector<8x1xf32>
    %24 = vector.broadcast %21 : vector<8x1xf32> to vector<8x8xf32>
    %25 = arith.subf %16, %24 : vector<8x8xf32>
    %26 = math.exp %25 : vector<8x8xf32>
    %27 = arith.mulf %26, %17 : vector<8x8xf32>
    %28 = vector.shape_cast %27 : vector<8x8xf32> to vector<8x1x8xf32>
    "tpu.trace_start"() <{level = 10 : i32, message = "bqs,bsd->bqd"}> : () -> ()
    %cst_17 = arith.constant dense<0.000000e+00> : vector<8x1x128xf32>
    %29 = tpu.matmul %28, %3, %cst_17 {dimension_numbers = #tpu.dot_dimension_numbers<[2], [1], [1], [2], [0, 0, 0, 1, 1, 2], [0], [0]>} : vector<8x1x8xf32>, vector<8x8x128xf32>, vector<8x1x128xf32> -> vector<8x1x128xf32>
    "tpu.trace_stop"() : () -> ()
    %30 = vector.shape_cast %29 : vector<8x1x128xf32> to vector<8x128xf32>
    %c0_18 = arith.constant 0 : index
    %c0_19 = arith.constant 0 : index
    %31 = vector.load %arg9[%c0_18, %c0_19] : memref<8x128xf32, #tpu.memory_space<vmem>>, vector<8x128xf32>
    %32 = vector.broadcast %23 : vector<8x1xf32> to vector<8x128xf32>
    %33 = arith.mulf %31, %32 : vector<8x128xf32>
    %34 = arith.addf %33, %30 : vector<8x128xf32>
    %c0_20 = arith.constant 0 : index
    %c0_21 = arith.constant 0 : index
    %35 = vector.load %arg9[%c0_20, %c0_21] : memref<8x128xf32, #tpu.memory_space<vmem>>, vector<8x128xf32>
    tpu.vector_store %arg9[%c0_20, %c0_21], %34 {strides = array<i32>} : memref<8x128xf32, #tpu.memory_space<vmem>>, vector<8x128xf32>,
    %c0_22 = arith.constant 0 : index
    %c0_23 = arith.constant 0 : index
    %36 = vector.load %arg10[%c0_22, %c0_23] : memref<8x1xf32, #tpu.memory_space<vmem>>, vector<8x1xf32>
    %37 = arith.mulf %36, %23 : vector<8x1xf32>
    %cst_24 = arith.constant dense<0.000000e+00> : vector<8xf32>
    %38 = vector.multi_reduction <add>, %27, %cst_24 [1] : vector<8x8xf32> to vector<8xf32>
    %39 = vector.shape_cast %38 : vector<8xf32> to vector<8x1xf32>
    %40 = arith.addf %37, %39 : vector<8x1xf32>
    %c0_25 = arith.constant 0 : index
    %c0_26 = arith.constant 0 : index
    %41 = vector.load %arg10[%c0_25, %c0_26] : memref<8x1xf32, #tpu.memory_space<vmem>>, vector<8x1xf32>
    tpu.vector_store %arg10[%c0_25, %c0_26], %40 {strides = array<i32>} : memref<8x1xf32, #tpu.memory_space<vmem>>, vector<8x1xf32>,
    %c0_27 = arith.constant 0 : index
    %c0_28 = arith.constant 0 : index
    %42 = vector.load %arg11[%c0_27, %c0_28] : memref<8x1xf32, #tpu.memory_space<vmem>>, vector<8x1xf32>
    tpu.vector_store %arg11[%c0_27, %c0_28], %21 {strides = array<i32>} : memref<8x1xf32, #tpu.memory_space<vmem>>, vector<8x1xf32>,
    %c0_i32_29 = arith.constant 0 : i32
    %43 = arith.cmpi eq, %arg1, %c0_i32_29 : i32
    %44 = arith.extui %43 : i1 to i32
    %c0_i32_30 = arith.constant 0 : i32
    %45 = arith.cmpi ne, %44, %c0_i32_30 : i32
    scf.if %45 {
      %c0_31 = arith.constant 0 : index
      %c0_32 = arith.constant 0 : index
      %46 = vector.load %arg11[%c0_31, %c0_32] : memref<8x1xf32, #tpu.memory_space<vmem>>, vector<8x1xf32>
      %cst_33 = arith.constant -18.420681 : f32
      %47 = vector.broadcast %cst_33 : f32 to vector<8x1xf32>
      %48 = arith.subf %47, %46 : vector<8x1xf32>
      %cst_34 = arith.constant 8.000000e+01 : f32
      %49 = vector.broadcast %cst_34 : f32 to vector<8x1xf32>
      %50 = arith.minimumf %48, %49 : vector<8x1xf32>
      %51 = math.exp %50 : vector<8x1xf32>
      %c0_35 = arith.constant 0 : index
      %c0_36 = arith.constant 0 : index
      %52 = vector.load %arg9[%c0_35, %c0_36] : memref<8x128xf32, #tpu.memory_space<vmem>>, vector<8x128xf32>
      %c0_37 = arith.constant 0 : index
      %c0_38 = arith.constant 0 : index
      %53 = vector.load %arg10[%c0_37, %c0_38] : memref<8x1xf32, #tpu.memory_space<vmem>>, vector<8x1xf32>
      %54 = arith.addf %53, %51 : vector<8x1xf32>
      %55 = vector.broadcast %54 : vector<8x1xf32> to vector<8x128xf32>
      %56 = arith.divf %52, %55 : vector<8x128xf32>
      %c0_39 = arith.constant 0 : index
      %c0_40 = arith.constant 0 : index
      %57 = vector.load %arg8[%c0_39, %c0_40] : memref<8x128xf32, #tpu.memory_space<vmem>>, vector<8x128xf32>
      tpu.vector_store %arg8[%c0_39, %c0_40], %56 {strides = array<i32>} : memref<8x128xf32, #tpu.memory_space<vmem>>, vector<8x128xf32>,
    } else {
    }
    return
  }
  func.func @transform_0(%arg0: i32, %arg1: i32) -> (i32, i32, i32) {
    %c0_i32 = arith.constant 0 : i32
    %c0_i32_0 = arith.constant 0 : i32
    return %arg0, %arg1, %c0_i32 : i32, i32, i32
  }
  func.func @transform_1(%arg0: i32, %arg1: i32) -> (i32, i32) {
    %c0_i32 = arith.constant 0 : i32
    return %arg0, %arg1 : i32, i32
  }
  func.func @transform_2(%arg0: i32, %arg1: i32) -> (i32, i32) {
    %c0_i32 = arith.constant 0 : i32
    %c0_i32_0 = arith.constant 0 : i32
    %c0_i32_1 = arith.constant 0 : i32
    return %c0_i32, %c0_i32_0 : i32, i32
  }
  func.func @transform_3(%arg0: i32, %arg1: i32) -> (i32, i32) {
    %c0_i32 = arith.constant 0 : i32
    %c0_i32_0 = arith.constant 0 : i32
    %c0_i32_1 = arith.constant 0 : i32
    return %c0_i32, %c0_i32_0 : i32, i32
  }
  func.func @transform_4(%arg0: i32, %arg1: i32) -> (i32, i32) {
    %c0_i32 = arith.constant 0 : i32
    %c0_i32_0 = arith.constant 0 : i32
    %c0_i32_1 = arith.constant 0 : i32
    return %c0_i32, %c0_i32_0 : i32, i32
  }
  func.func @transform_5(%arg0: i32, %arg1: i32) -> (i32, i32) {
    %c0_i32 = arith.constant 0 : i32
    %c0_i32_0 = arith.constant 0 : i32
    %c0_i32_1 = arith.constant 0 : i32
    return %c0_i32, %c0_i32_0 : i32, i32
  }
  func.func @transform_6(%arg0: i32, %arg1: i32) -> (i32, i32) {
    %c0_i32 = arith.constant 0 : i32
    %c0_i32_0 = arith.constant 0 : i32
    return %arg0, %c0_i32 : i32, i32
  }
}

</mosaic_0001>

<bundles_post_ra>
// kernel: tpu_custom_call.1
= control target key start
LH: loop header
LB: loop body
LE: loop exit
PB: predicated region body
PF: predicated region fallthrough
CT: control target
= control target key end

     0   :  { %12 = vsyncpa [#allocation7], 0  ;;  %s1967_s0 = inlined_call_operand.hbm [shape: f32[8,8,128], index: 0, kind: input, shape index: {}]   ;;  %s1968_s1 = inlined_call_operand.vmem [shape: f32[8,8], index: 1, kind: input, shape index: {}]   ;;  %s1969_s2 = inlined_call_operand.vmem [shape: f32[128,128], index: 2, kind: input, shape index: {}]   ;;  %s1970_s3 = inlined_call_operand.vmem [shape: f32[1,128], index: 3, kind: input, shape index: {}]   ;;  %s1971_s4 = inlined_call_operand.vmem [shape: f32[128,1], index: 4, kind: input, shape index: {}]   ;;  %s1972_s5 = inlined_call_operand.<no memory space> [shape: f32[1,1], index: 5, kind: input, shape index: {}]   ;;  %s1973_s6 = inlined_call_operand.hbm [shape: f32[8,128], index: 6, kind: output, shape index: {}]  }
   0x1   :  { %13 = vsyncpa [#allocation8], 0  ;;  %s1630_s21 = smov [#allocation6]   ;;  %s1582_s25 = scalar_lea.hbm %s1967_s0, 1024 }
   0x2   :  { %s19_s22 = sshll.u32 %s1630_s21, 4  ;;  %p1583_p0 = scmp.ne.s32.totalorder %s1967_s0, %s1582_s25  ;;  %s20_s22 = int_to_ptr.vmem [resolvable:$true] %s19_s22 }
   0x3   :  { %p1586_p1 = scmp.lt.u32.totalorder %s1582_s25, %s1967_s0 }
   0x5   :  { %p1588_p2 = pnand %p1586_p1, %p1583_p0 }
   0x7   :  { %1591 = shalt.err (!%p1588_p2)
}
   0x8   :  { %s1592_s30 = scalar_lea.vmem %s20_s22, 1024  ;;  %p1597_p4 = scmp.lt.s32.totalorder %s20_s22, %s20_s22 }
   0x9   :  { %p1593_p3 = scmp.ne.s32.totalorder %s20_s22, %s1592_s30  ;;  %p1598_p5 = scmp.lt.s32.totalorder %s1592_s30, %s1592_s30 }
   0xb   :  { %p1599_p6 = por %p1598_p5, %p1597_p4 }
   0xd   :  { %p1600_p7 = pnand %p1599_p6, %p1593_p3 }
   0xf   :  { %1603 = shalt.err (!%p1600_p7)
}
  0x10   :  { %s1631_s7 = smov 128   ;;  %s1632_s8 = smov 8  }
  0x11   :  { %25 = dma.hbm_to_vmem [thread:$0]  %s1967_s0, 1024, %s20_s22, [#allocation7], %s1631_s7, %s1631_s7, %s1632_s8  }
  0x12   :  { %1626 = dma.done.wait [#allocation7], 1024  }
  0x13   :  { %1627 = vsyncadd [#allocation7], 4294966272  ;;  %v55_v0 = vld [vmem:[%s1969_s2] sm:$0xff]  ;;  %v56_v1 = vld [vmem:[%s1969_s2 + $0x8] sm:$0xff]  ;;  %vm44_vm0 = vcmask 7168   ;;  %vm382_vm1 = vcmask 1041409  }
  0x14   :  { %v57_v2 = vld [vmem:[%s1969_s2 + $0x10] sm:$0xff]  ;;  %v1470_v3 = vpack.c.bf16 %v56_v1, %v55_v0  ;;  %v58_v4 = vld [vmem:[%s1969_s2 + $0x18] sm:$0xff]  ;;  %v59_v6 = vld [vmem:[%s1969_s2 + $0x20] sm:$0xff]  ;;  %vm384_vm2 = vcmask 1042434   ;;  %vm386_vm3 = vcmask 1043459   ;;  %vm388_vm4 = vcmask 1044484  }
  0x15   :  { %v1474_v5 = vpack.c.bf16 %v58_v4, %v57_v2  ;;  %v60_v7 = vld [vmem:[%s1969_s2 + $0x28] sm:$0xff]  ;;  %v1703_v9 = vld [vmem:[#allocation6] sm:$0xff]  ;;  %v62_v11 = vld [vmem:[%s1969_s2 + $0x38] sm:$0xff]  ;;  %vm390_vm5 = vcmask 1045509   ;;  %vm392_vm6 = vcmask 1046534   ;;  %vm394_vm7 = vcmask 1047559  }
  0x16   :  { %1471 = vmatprep.subr.bf16.mxu0 %v1470_v3  ;;  %v1478_v8 = vpack.c.bf16 %v60_v7, %v59_v6  ;;  %v61_v10 = vld [vmem:[%s1969_s2 + $0x30] sm:$0xff]  ;;  %1374 = vmatprep.mubr.f32.mxu0 %v1703_v9  ;;  %v191_v12 = vld [vmem:[%s1971_s4] sm:$0xff]  ;;  %v192_v13 = vld [vmem:[%s1971_s4 + $0x8] sm:$0xff]  ;;  %vm397_vm8 = vcmask 64512   ;;  %vm1636_vm9 = vmmov 0  }
  0x17   :  { %1473 = vmatpush3.bf16.msra.mxu0 %v1470_v3  ;;  %v193_v14 = vld [vmem:[%s1971_s4 + $0x10] sm:$0xff]  ;;  %v1482_v15 = vpack.c.bf16 %v62_v11, %v61_v10  ;;  %v63_v16 = vld [vmem:[%s1969_s2 + $0x40] sm:$0xff]  ;;  %v1502_v17 = vpack.c.bf16 %v192_v13, %v191_v12  ;;  %v194_v18 = vld [vmem:[%s1971_s4 + $0x18] sm:$0xff] }
  0x18   :  { %1475 = vmatprep.subr.bf16.mxu0 %v1474_v5  ;;  %v64_v19 = vld [vmem:[%s1969_s2 + $0x48] sm:$0xff]  ;;  %v1506_v20 = vpack.c.bf16 %v194_v18, %v193_v14  ;;  %v195_v21 = vld [vmem:[%s1971_s4 + $0x20] sm:$0xff]  ;;  %v65_v24 = vld [vmem:[%s1969_s2 + $0x50] sm:$0xff]  ;;  %v1633_v18 = vmov 0  }
  0x19   :  { %v196_v22 = vld [vmem:[%s1971_s4 + $0x28] sm:$0xff]  ;;  %1503 = vmatprep.subr.bf16.mxu1 %v1502_v17  ;;  %v1486_v23 = vpack.c.bf16 %v64_v19, %v63_v16  ;;  %v66_v26 = vld [vmem:[%s1969_s2 + $0x58] sm:$0xff]  ;;  %v197_v27 = vld [vmem:[%s1971_s4 + $0x30] sm:$0xff]  ;;  %1542 = vset.pattern.permute.xlu0 %v1633_v18  ;;  %v208_v19 = vstv %s1972_s5 }
  0x1a   :  { %1505 = vmatpush3.bf16.msra.mxu1 %v1502_v17  ;;  %v1510_v25 = vpack.c.bf16 %v196_v22, %v195_v21  ;;  %v198_v28 = vld [vmem:[%s1971_s4 + $0x38] sm:$0xff]  ;;  %v1490_v29 = vpack.c.bf16 %v66_v26, %v65_v24  ;;  %v67_v31 = vld [vmem:[%s1969_s2 + $0x60] sm:$0xff]  ;;  %v68_v32 = vld [vmem:[%s1969_s2 + $0x68] sm:$0xff]  ;;  %1543 = vset.pattern.permute.xlu1 %v1633_v18 }
  0x1b   :  { %1477 = vmatpush3.bf16.msra.mxu0 %v1474_v5  ;;  %1507 = vmatprep.subr.bf16.mxu1 %v1506_v20  ;;  %v1514_v30 = vpack.c.bf16 %v198_v28, %v197_v27  ;;  %v1494_v33 = vpack.c.bf16 %v68_v32, %v67_v31  ;;  %v69_v34 = vld [vmem:[%s1969_s2 + $0x70] sm:$0xff]  ;;  %v70_v35 = vld [vmem:[%s1969_s2 + $0x78] sm:$0xff]  ;;  %v1762_v38 = vld [vmem:[#allocation6 + $0x10] sm:$0xff] }
  0x1c   :  { %1479 = vmatprep.subr.bf16.mxu0 %v1478_v8  ;;  %v1498_v36 = vpack.c.bf16 %v70_v35, %v69_v34  ;;  %v1760_v37 = vld [vmem:[#allocation6 + $0x8] sm:$0xff]  ;;  %v1766_v39 = vld [vmem:[#allocation6 + $0x18] sm:$0xff]  ;;  %v1768_v40 = vld [vmem:[#allocation6 + $0x20] sm:$0xff] }
  0x1d   :  { %v1772_v41 = vld [vmem:[#allocation6 + $0x28] sm:$0xff]  ;;  %v1774_v42 = vld [vmem:[#allocation6 + $0x30] sm:$0xff]  ;;  %v1778_v43 = vld [vmem:[#allocation6 + $0x38] sm:$0xff] }
  0x1e   :  { %1509 = vmatpush3.bf16.msra.mxu1 %v1506_v20  ;;  %v199_v44 = vld [vmem:[%s1971_s4 + $0x40] sm:$0xff]  ;;  %v200_v45 = vld [vmem:[%s1971_s4 + $0x48] sm:$0xff]  ;;  %v201_v47 = vld [vmem:[%s1971_s4 + $0x50] sm:$0xff] }
  0x1f   :  { %1481 = vmatpush3.bf16.msra.mxu0 %v1478_v8  ;;  %1511 = vmatprep.subr.bf16.mxu1 %v1510_v25  ;;  %v1518_v46 = vpack.c.bf16 %v200_v45, %v199_v44  ;;  %v202_v48 = vld [vmem:[%s1971_s4 + $0x58] sm:$0xff]  ;;  %v203_v50 = vld [vmem:[%s1971_s4 + $0x60] sm:$0xff]  ;;  %v204_v51 = vld [vmem:[%s1971_s4 + $0x68] sm:$0xff]  ;;  %v348_v44 = vlaneseq }
  0x20   :  { %1483 = vmatprep.subr.bf16.mxu0 %v1482_v15  ;;  %v1522_v49 = vpack.c.bf16 %v202_v48, %v201_v47  ;;  %v1526_v52 = vpack.c.bf16 %v204_v51, %v203_v50  ;;  %v205_v53 = vld [vmem:[%s1971_s4 + $0x70] sm:$0xff]  ;;  %v206_v54 = vld [vmem:[%s1971_s4 + $0x78] sm:$0xff]  ;;  %v1269_v56 = vld [vmem:[%s1970_s3] ss:$0 sm:$0xff] }
  0x21   :  { %v1530_v55 = vpack.c.bf16 %v206_v54, %v205_v53  ;;  %v349_v45 = vand.u32 127, %v348_v44 }
  0x22   :  { %1513 = vmatpush3.bf16.msra.mxu1 %v1510_v25 }
  0x23   :  { %1485 = vmatpush3.bf16.msra.mxu0 %v1482_v15  ;;  %1515 = vmatprep.subr.bf16.mxu1 %v1514_v30 }
  0x24   :  { %1487 = vmatprep.subr.bf16.mxu0 %v1486_v23 }
  0x26   :  { %1517 = vmatpush3.bf16.msra.mxu1 %v1514_v30 }
  0x27   :  { %1489 = vmatpush3.bf16.msra.mxu0 %v1486_v23  ;;  %1519 = vmatprep.subr.bf16.mxu1 %v1518_v46 }
  0x28   :  { %1491 = vmatprep.subr.bf16.mxu0 %v1490_v29 }
  0x2a   :  { %1521 = vmatpush3.bf16.msra.mxu1 %v1518_v46  ;;  %v1836_v46 = vshrl.u32 %v348_v44, 7 }
  0x2b   :  { %1493 = vmatpush3.bf16.msra.mxu0 %v1490_v29  ;;  %1523 = vmatprep.subr.bf16.mxu1 %v1522_v49 }
  0x2c   :  { %1495 = vmatprep.subr.bf16.mxu0 %v1494_v33  ;;  %v1839_v48 = vsub.s32 %v349_v45, %v1836_v46 }
  0x2e   :  { %1525 = vmatpush3.bf16.msra.mxu1 %v1522_v49 }
  0x2f   :  { %1497 = vmatpush3.bf16.msra.mxu0 %v1494_v33  ;;  %1527 = vmatprep.subr.bf16.mxu1 %v1526_v52 }
  0x30   :  { %1499 = vmatprep.subr.bf16.mxu0 %v1498_v36 }
  0x32   :  { %1529 = vmatpush3.bf16.msra.mxu1 %v1526_v52 }
  0x33   :  { %1501 = vmatpush3.bf16.msra.mxu0 %v1498_v36  ;;  %1531 = vmatprep.subr.bf16.mxu1 %v1530_v55  ;;  %v1634_v36 = vmov -inf  }
  0x34   :  { %46 = vst.msk [vmem:[#allocation4] sm:$0xff] %vm44_vm0, %v1634_v36 }
  0x36   :  { %1375 = vmatmul.mubr.f32.vlgmr.msra.gmra.mrb[0].mxu0 %v1760_v37  ;;  %1533 = vmatpush3.bf16.msra.mxu1 %v1530_v55 }
  0x37   :  { %1377 = vmatprep.mubr.f32.mxu0 %v1762_v38 }
  0x3a   :  { %1378 = vmatmul.mubr.f32.gmra.mrb[2].mxu0 %v1766_v39 }
  0x3b   :  { %1380 = vmatprep.mubr.f32.mxu0 %v1768_v40 }
  0x3e   :  { %1381 = vmatmul.mubr.f32.gmra.mrb[4].mxu0 %v1772_v41 }
  0x3f   :  { %1383 = vmatprep.mubr.f32.mxu0 %v1774_v42 }
  0x42   :  { %1384 = vmatmul.mubr.f32.gmra.mrb[6].mxu0 %v1778_v43 }
 0x109   :  { %v1376_v57 = vpop.f32.mrb[0].mxu0 }
 0x10a   :  { %v150_v58 = vadd.f32 %v1376_v57, %v1269_v56  ;;  %v144_v59 = vpop.f32.mrb[1].mxu0 }
 0x10b   :  { %v145_v60 = vadd.f32 %v1269_v56, %v144_v59 }
 0x10d   :  { %1544 = vtanh.f32 %v145_v60  ;;  %v1379_v61 = vpop.f32.mrb[2].mxu0 }
 0x10e   :  { %1546 = vtanh.f32 %v150_v58  ;;  %v160_v62 = vadd.f32 %v1379_v61, %v1269_v56  ;;  %v154_v63 = vpop.f32.mrb[3].mxu0 }
 0x10f   :  { %v155_v0 = vadd.f32 %v1269_v56, %v154_v63 }
 0x111   :  { %1548 = vtanh.f32 %v155_v0  ;;  %v1382_v1 = vpop.f32.mrb[4].mxu0 }
 0x112   :  { %1550 = vtanh.f32 %v160_v62  ;;  %v170_v2 = vadd.f32 %v1382_v1, %v1269_v56  ;;  %v164_v3 = vpop.f32.mrb[5].mxu0 }
 0x113   :  { %v165_v4 = vadd.f32 %v1269_v56, %v164_v3 }
 0x114   :  { %1552 = vtanh.f32 %v170_v2 }
 0x115   :  { %1554 = vtanh.f32 %v165_v4  ;;  %v1385_v5 = vpop.f32.mrb[6].mxu0 }
 0x116   :  { %v180_v6 = vadd.f32 %v1385_v5, %v1269_v56  ;;  %v174_v7 = vpop.f32.mrb[7].mxu0 }
 0x117   :  { %v1545_v8 = vpop.eup %1544  ;;  %v175_v10 = vadd.f32 %v1269_v56, %v174_v7 }
 0x118   :  { %v1547_v11 = vpop.eup %1546  ;;  %1556 = vtanh.f32 %v180_v6  ;;  %1418 = vmatprep.mubr.f32.mxu1 %v1545_v8  ;;  %v1635_v8 = vmov 0.0  }
 0x119   :  { %1558 = vtanh.f32 %v175_v10  ;;  %1419 = vmatmul.mubr.f32.vlgmr.msra.gmra.mrb[0].mxu1 %v1547_v11  ;;  %1430 = vmatprep.subr.mxu0 %v1635_v8  ;;  %45 = vst.msk [vmem:[#allocation3] sm:$0xff] %vm44_vm0, %v1635_v8  ;;  %v439_v10 = vsub.s32 7, %v1836_v46  ;;  %v314_v11 = vld [vmem:[%s1968_s1] sm:$0xff]  ;;  %s1637_s1 = smov [#allocation9]  }
 0x11a   :  { %1435 = vmatprep.subr.mxu1 %v1635_v8  ;;  %1431 = vmatpush3.msra.mxu0 %v1703_v9  ;;  %s1260_s26 = sshll.u32 %s1637_s1, 4  ;;  %s1261_s26 = int_to_ptr.vmem [resolvable:$true] %s1260_s26 }
 0x11b   :  { %v1549_v12 = vpop.eup %1548  ;;  %1436 = vmatpush3.msra.mxu1 %v1760_v37  ;;  %1440 = vmatprep.subr.mxu0 %v1635_v8  ;;  %s1604_s27 = scalar_lea.vmem %s1261_s26, 128  ;;  %p1609_p9 = scmp.lt.s32.totalorder %s1261_s26, %s1261_s26 }
 0x11c   :  { %v1551_v13 = vpop.eup %1550  ;;  %1421 = vmatprep.mubr.f32.mxu1 %v1549_v12  ;;  %1445 = vmatprep.subr.mxu1 %v1635_v8  ;;  %v526_v12 = vrot.slane %v314_v11, %v439_v10  ;;  %p1605_p8 = scmp.ne.s32.totalorder %s1261_s26, %s1604_s27  ;;  %p1610_p10 = scmp.lt.s32.totalorder %s1604_s27, %s1604_s27 }
 0x11d   :  { %1422 = vmatmul.mubr.f32.gmra.mrb[2].mxu1 %v1551_v13  ;;  %v1869_v13 = vld [vmem:[#allocation4] sm:$0xff]  ;;  %1432 = vmatprep.mubr.msk.f32.mxu0 %vm1636_vm9, %v1635_v8 }
 0x11e   :  { %v1553_v14 = vpop.eup %1552  ;;  %p1611_p11 = por %p1610_p10, %p1609_p9 }
 0x11f   :  { %v1555_v15 = vpop.eup %1554 }
 0x120   :  { %1424 = vmatprep.mubr.f32.mxu1 %v1555_v15  ;;  %p1612_p12 = pnand %p1611_p11, %p1605_p8 }
 0x121   :  { %1425 = vmatmul.mubr.f32.gmra.mrb[4].mxu1 %v1553_v14  ;;  %v411_v14 = vsub.s32 0, %v1836_v46 }
 0x122   :  { %v1557_v16 = vpop.eup %1556 }
 0x123   :  { %v1559_v17 = vpop.eup %1558 }
 0x124   :  { %1427 = vmatprep.mubr.f32.mxu1 %v1559_v17  ;;  %v415_v17 = vsub.s32 1, %v1836_v46 }
 0x125   :  { %1428 = vmatmul.mubr.f32.gmra.mrb[6].mxu1 %v1557_v16  ;;  %v477_v16 = vrot.slane %v314_v11, %v411_v14 }
 0x126   :  { %v484_v18 = vrot.slane %v314_v11, %v415_v17  ;;  %1437 = vmatprep.mubr.msk.f32.mxu1 %vm1636_vm9, %v1635_v8 }
 0x1ec   :  { %v1420_v20 = vpop.f32.mrb[0].mxu1 }
 0x1ed   :  { %v1811_v21 = vadd.f32 %v1420_v20, %v208_v19  ;;  %v275_v22 = vpop.f32.mrb[1].mxu1 }
 0x1ee   :  { %v1814_v24 = vadd.f32 %v275_v22, %v208_v19  ;;  %v423_v22 = vsub.s32 3, %v1836_v46 }
 0x1ef   :  { %328 = vperm.xlu0 %1542, %v1811_v21  }
 0x1f0   :  { %v1423_v23 = vpop.f32.mrb[2].mxu1 }
 0x1f1   :  { %v1816_v25 = vadd.f32 %v1423_v23, %v208_v19  ;;  %v285_v26 = vpop.f32.mrb[3].mxu1  ;;  %v498_v23 = vrot.slane %v314_v11, %v423_v22 }
 0x1f2   :  { %v1820_v28 = vadd.f32 %v285_v26, %v208_v19  ;;  %v427_v26 = vsub.s32 4, %v1836_v46 }
 0x1f3   :  { %334 = vperm.xlu1 %1543, %v1816_v25   ;;  %325 = vperm.xlu0 %1542, %v1814_v24  }
 0x1f4   :  { %v1426_v27 = vpop.f32.mrb[4].mxu1 }
 0x1f5   :  { %v295_v29 = vpop.f32.mrb[5].mxu1  ;;  %v1826_v32 = vadd.f32 %v1426_v27, %v208_v19  ;;  %v505_v27 = vrot.slane %v314_v11, %v427_v26 }
 0x1f6   :  { %v1822_v30 = vadd.f32 %v295_v29, %v208_v19  ;;  %v431_v29 = vsub.s32 5, %v1836_v46 }
 0x1f7   :  { %331 = vperm.xlu1 %1543, %v1820_v28  }
 0x1f8   :  { %v1429_v31 = vpop.f32.mrb[6].mxu1  ;;  %337 = vperm.xlu0 %1542, %v1822_v30  }
 0x1f9   :  { %v305_v33 = vpop.f32.mrb[7].mxu1  ;;  %v1832_v35 = vadd.f32 %v1429_v31, %v208_v19  ;;  %v512_v31 = vrot.slane %v314_v11, %v431_v29 }
 0x1fa   :  { %v1828_v34 = vadd.f32 %v305_v33, %v208_v19  ;;  %v419_v19 = vsub.s32 2, %v1836_v46  ;;  %v435_v33 = vsub.s32 6, %v1836_v46 }
 0x1fb   :  { %340 = vperm.xlu1 %1543, %v1826_v32  }
 0x1fc   :  { %343 = vperm.xlu0 %1542, %v1828_v34   ;;  %v491_v20 = vrot.slane %v314_v11, %v419_v19  ;;  %v519_v36 = vrot.slane %v314_v11, %v435_v33 }
 0x1ff   :  { %346 = vperm.xlu1 %1543, %v1832_v35  }
 0x26e   :  { %v329_v47 = vpop.permute.xlu0 %328 }
 0x26f   :  { %v357_v52 = vrot.slane %v329_v47, %v1839_v48 }
 0x272   :  { %v335_v49 = vpop.permute.xlu1 %334  ;;  %v326_v50 = vpop.permute.xlu0 %325 }
 0x273   :  { %v353_v51 = vrot.slane %v326_v50, %v1839_v48  ;;  %v365_v56 = vrot.slane %v335_v49, %v1839_v48 }
 0x275   :  { %v383_v57 = vsel %vm382_vm1, %v357_v52, %v353_v51 }
 0x276   :  { %v332_v53 = vpop.permute.xlu1 %331 }
 0x277   :  { %v361_v54 = vrot.slane %v332_v53, %v1839_v48  ;;  %v338_v55 = vpop.permute.xlu0 %337 }
 0x278   :  { %v369_v58 = vrot.slane %v338_v55, %v1839_v48 }
 0x279   :  { %v385_v59 = vsel %vm384_vm2, %v361_v54, %v383_v57 }
 0x27a   :  { %v387_v60 = vsel %vm386_vm3, %v365_v56, %v385_v59  ;;  %v341_v61 = vpop.permute.xlu1 %340 }
 0x27b   :  { %v389_v62 = vsel %vm388_vm4, %v369_v58, %v387_v60  ;;  %v373_v63 = vrot.slane %v341_v61, %v1839_v48  ;;  %v344_v0 = vpop.permute.xlu0 %343 }
 0x27c   :  { %v377_v1 = vrot.slane %v344_v0, %v1839_v48 }
 0x27d   :  { %v391_v2 = vsel %vm390_vm5, %v373_v63, %v389_v62 }
 0x27e   :  { %v347_v3 = vpop.permute.xlu1 %346  ;;  %v393_v5 = vsel %vm392_vm6, %v377_v1, %v391_v2 }
 0x27f   :  { %v381_v4 = vrot.slane %v347_v3, %v1839_v48 }
 0x281   :  { %v395_v6 = vsel %vm394_vm7, %v381_v4, %v393_v5 }
 0x282   :  { %v398_v7 = vsel %vm397_vm8, %v395_v6, -inf }
 0x283   :  { %399 = vmax.xlane.f32.xlu0 %v398_v7 }
 0x299   :  { %528 = vbcast.lane.b32.xlu0 %v526_v12, 256 }
 0x310   :  { %v400_v15 = vpop.xlane.xlu0 %399 }
 0x311   :  { %v1873_v9 = vmax.f32 %v1869_v13, %v400_v15 }
 0x313   :  { %v402_v37 = vsub.f32 %v1869_v13, %v1873_v9  ;;  %1234 = vst.msk [vmem:[#allocation4] sm:$0xff] %vm44_vm0, %v1873_v9  ;;  %407 = vperm.xlu1 %1543, %v1873_v9  }
 0x317   :  { %479 = vbcast.lane.b32.xlu1 %v477_v16, 256 }
 0x31b   :  { %486 = vbcast.lane.b32.xlu1 %v484_v18, 256 }
 0x31f   :  { %493 = vbcast.lane.b32.xlu1 %v491_v20, 256 }
 0x323   :  { %500 = vbcast.lane.b32.xlu1 %v498_v23, 256 }
 0x327   :  { %507 = vbcast.lane.b32.xlu1 %v505_v27, 256 }
 0x32b   :  { %514 = vbcast.lane.b32.xlu1 %v512_v31, 256 }
 0x32f   :  { %521 = vbcast.lane.b32.xlu1 %v519_v36, 256 }
 0x392   :  { %v408_v44 = vpop.permute.xlu1 %407 }
 0x393   :  { %v412_v45 = vrot.slane %v408_v44, %v411_v14  ;;  %v416_v47 = vrot.slane %v408_v44, %v415_v17  ;;  %v420_v49 = vrot.slane %v408_v44, %v419_v19  ;;  %v424_v56 = vrot.slane %v408_v44, %v423_v22 }
 0x394   :  { %v436_v57 = vrot.slane %v408_v44, %v435_v33  ;;  %v428_v61 = vrot.slane %v408_v44, %v427_v26  ;;  %v432_v0 = vrot.slane %v408_v44, %v431_v29  ;;  %v440_v2 = vrot.slane %v408_v44, %v439_v10  ;;  %v529_v26 = vpop.permute.xlu0 %528 }
 0x395   :  { %v449_v50 = vsub.f32 %v1814_v24, %v412_v45  ;;  %v450_v51 = vsub.f32 %v1811_v21, %v416_v47  ;;  %v451_v55 = vsub.f32 %v1820_v28, %v420_v49  ;;  %v452_v59 = vsub.f32 %v1816_v25, %v424_v56 }
 0x396   :  { %v480_v52 = vpop.permute.xlu1 %479  ;;  %v455_v60 = vsub.f32 %v1828_v34, %v436_v57  ;;  %v453_v63 = vsub.f32 %v1822_v30, %v428_v61  ;;  %v454_v25 = vsub.f32 %v1826_v32, %v432_v0  ;;  %v456_v6 = vsub.f32 %v1832_v35, %v440_v2  ;;  %v1238_v61 = vld [vmem:[#allocation4] sm:$0xff] }
 0x397   :  { %v457_v53 = vmul.f32 1.442695, %v449_v50  ;;  %v459_v54 = vmul.f32 1.442695, %v450_v51  ;;  %v461_v58 = vmul.f32 1.442695, %v451_v55 }
 0x398   :  { %v463_v24 = vmul.f32 1.442695, %v452_v59  ;;  %v469_v21 = vmul.f32 1.442695, %v455_v60  ;;  %v465_v5 = vmul.f32 1.442695, %v453_v63 }
 0x399   :  { %1560 = vpow2.f32 %v457_v53  ;;  %v467_v10 = vmul.f32 1.442695, %v454_v25  ;;  %v471_v12 = vmul.f32 1.442695, %v456_v6  ;;  %v403_v60 = vmul.f32 1.442695, %v402_v37 }
 0x39a   :  { %v487_v46 = vpop.permute.xlu1 %486  ;;  %1562 = vpow2.f32 %v459_v54 }
 0x39b   :  { %1564 = vpow2.f32 %v461_v58 }
 0x39c   :  { %1566 = vpow2.f32 %v463_v24  ;;  %v1218_v24 = vld [vmem:[#allocation3] sm:$0xff] }
 0x39d   :  { %1568 = vpow2.f32 %v469_v21 }
 0x39e   :  { %v494_v62 = vpop.permute.xlu1 %493  ;;  %1570 = vpow2.f32 %v465_v5 }
 0x39f   :  { %1572 = vpow2.f32 %v467_v10 }
 0x3a0   :  { %1574 = vpow2.f32 %v471_v12 }
 0x3a1   :  { %1576 = vpow2.f32 %v403_v60 }
 0x3a2   :  { %v501_v1 = vpop.permute.xlu1 %500 }
 0x3a3   :  { %v1561_v28 = vpop.eup %1560 }
 0x3a4   :  { %v538_v3 = vmul.f32 %v1561_v28, %v480_v52  ;;  %v1563_v4 = vpop.eup %1562 }
 0x3a5   :  { %v539_v30 = vmul.f32 %v1563_v4, %v487_v46  ;;  %v1565_v7 = vpop.eup %1564 }
 0x3a6   :  { %548 = vperm.xlu1 %1543, %v538_v3   ;;  %v508_v34 = vpop.permute.xlu1 %507  ;;  %v540_v14 = vmul.f32 %v1565_v7, %v494_v62  ;;  %v1567_v32 = vpop.eup %1566 }
 0x3a7   :  { %v1569_v15 = vpop.eup %1568  ;;  %v541_v17 = vmul.f32 %v1567_v32, %v501_v1 }
 0x3a8   :  { %v1571_v18 = vpop.eup %1570 }
 0x3a9   :  { %v542_v19 = vmul.f32 %v1571_v18, %v508_v34  ;;  %v1573_v20 = vpop.eup %1572 }
 0x3aa   :  { %628 = vperm.xlu1 %1543, %v539_v30   ;;  %v515_v11 = vpop.permute.xlu1 %514  ;;  %v1575_v23 = vpop.eup %1574 }
 0x3ab   :  { %v543_v22 = vmul.f32 %v1573_v20, %v515_v11  ;;  %v545_v27 = vmul.f32 %v1575_v23, %v529_v26 }
 0x3ae   :  { %708 = vperm.xlu1 %1543, %v540_v14   ;;  %v522_v35 = vpop.permute.xlu1 %521 }
 0x3af   :  { %v544_v16 = vmul.f32 %v1569_v15, %v522_v35 }
 0x3b1   :  { %1028 = vperm.xlu0 %1542, %v544_v16  }
 0x3b2   :  { %788 = vperm.xlu1 %1543, %v541_v17  }
 0x3b6   :  { %868 = vperm.xlu1 %1543, %v542_v19  }
 0x3ba   :  { %948 = vperm.xlu1 %1543, %v543_v22  }
 0x3be   :  { %1108 = vperm.xlu1 %1543, %v545_v27  }
 0x425   :  { %v549_v29 = vpop.permute.xlu1 %548 }
 0x426   :  { %v553_v31 = vrot.slane %v549_v29, %v1839_v48 }
 0x428   :  { %1433 = vmatmul.mubr.msk.f32.vlgmr.msra.gmra.mrb[8].mxu0 %vm397_vm8, %v553_v31 }
 0x429   :  { %v629_v33 = vpop.permute.xlu1 %628  ;;  %1441 = vmatpush3.msra.mxu0 %v1762_v38  ;;  %1442 = vmatprep.mubr.msk.f32.mxu0 %vm1636_vm9, %v1635_v8 }
 0x42a   :  { %v633_v36 = vrot.slane %v629_v33, %v1839_v48  ;;  %1450 = vmatprep.subr.mxu0 %v1635_v8 }
 0x42c   :  { %1438 = vmatmul.mubr.msk.f32.vlgmr.msra.gmra.mrb[8].mxu1 %vm397_vm8, %v633_v36  ;;  %v1220_v50 = vsel %vm382_vm1, %v633_v36, %v553_v31 }
 0x42d   :  { %v709_v44 = vpop.permute.xlu1 %708  ;;  %1446 = vmatpush3.msra.mxu1 %v1766_v39  ;;  %1447 = vmatprep.mubr.msk.f32.mxu1 %vm1636_vm9, %v1635_v8 }
 0x42e   :  { %v713_v45 = vrot.slane %v709_v44, %v1839_v48  ;;  %1455 = vmatprep.subr.mxu1 %v1635_v8 }
 0x430   :  { %1443 = vmatmul.mubr.msk.f32.vlgmr.msra.gmra.mrb[10].mxu0 %vm397_vm8, %v713_v45  ;;  %v1221_v51 = vsel %vm384_vm2, %v713_v45, %v1220_v50 }
 0x431   :  { %v789_v38 = vpop.permute.xlu1 %788  ;;  %1451 = vmatpush3.msra.mxu0 %v1768_v40  ;;  %1452 = vmatprep.mubr.msk.f32.mxu0 %vm1636_vm9, %v1635_v8  ;;  %v1029_v40 = vpop.permute.xlu0 %1028 }
 0x432   :  { %v793_v47 = vrot.slane %v789_v38, %v1839_v48  ;;  %1460 = vmatprep.subr.mxu0 %v1635_v8 }
 0x434   :  { %1448 = vmatmul.mubr.msk.f32.vlgmr.msra.gmra.mrb[10].mxu1 %vm397_vm8, %v793_v47  ;;  %v1222_v53 = vsel %vm386_vm3, %v793_v47, %v1221_v51 }
 0x435   :  { %v869_v39 = vpop.permute.xlu1 %868  ;;  %1456 = vmatpush3.msra.mxu1 %v1772_v41  ;;  %1457 = vmatprep.mubr.msk.f32.mxu1 %vm1636_vm9, %v1635_v8  ;;  %v1033_v41 = vrot.slane %v1029_v40, %v1839_v48 }
 0x436   :  { %v873_v49 = vrot.slane %v869_v39, %v1839_v48  ;;  %1465 = vmatprep.subr.mxu1 %v1635_v8 }
 0x438   :  { %1453 = vmatmul.mubr.msk.f32.vlgmr.msra.gmra.mrb[12].mxu0 %vm397_vm8, %v873_v49  ;;  %v1223_v55 = vsel %vm388_vm4, %v873_v49, %v1222_v53 }
 0x439   :  { %v949_v52 = vpop.permute.xlu1 %948  ;;  %1461 = vmatpush3.msra.mxu0 %v1774_v42  ;;  %1462 = vmatprep.mubr.msk.f32.mxu0 %vm1636_vm9, %v1635_v8 }
 0x43a   :  { %v953_v54 = vrot.slane %v949_v52, %v1839_v48 }
 0x43c   :  { %v1224_v56 = vsel %vm390_vm5, %v953_v54, %v1223_v55  ;;  %1458 = vmatmul.mubr.msk.f32.vlgmr.msra.gmra.mrb[12].mxu1 %vm397_vm8, %v953_v54  ;;  %1463 = vmatmul.mubr.msk.f32.vlgmr.msra.gmra.mrb[14].mxu0 %vm397_vm8, %v1033_v41 }
 0x43d   :  { %v1109_v57 = vpop.permute.xlu1 %1108  ;;  %1466 = vmatpush3.msra.mxu1 %v1778_v43  ;;  %1467 = vmatprep.mubr.msk.f32.mxu1 %vm1636_vm9, %v1635_v8  ;;  %v1225_v46 = vsel %vm392_vm6, %v1033_v41, %v1224_v56  ;;  %v1239_v43 = vsub.f32 -18.420681, %v1238_v61  ;;  %v1577_v8 = vpop.eup %1576 }
 0x43e   :  { %v1113_v42 = vrot.slane %v1109_v57, %v1839_v48  ;;  %v1219_v21 = vmul.f32 %v1577_v8, %v1218_v24 }
 0x43f   :  { %v1240_v62 = vmin.f32 %v1239_v43, 80.0 }
 0x440   :  { %1468 = vmatmul.mubr.msk.f32.vlgmr.msra.gmra.mrb[14].mxu1 %vm397_vm8, %v1113_v42  ;;  %v1226_v58 = vsel %vm394_vm7, %v1113_v42, %v1225_v46 }
 0x441   :  { %v1228_v59 = vsel %vm397_vm8, %v1226_v58, 0.0  ;;  %v1241_v48 = vmul.f32 1.442695, %v1240_v62 }
 0x442   :  { %1229 = vadd.xlane.f32.xlu0 %v1228_v59 }
 0x443   :  { %1578 = vpow2.f32 %v1241_v48 }
 0x44d   :  { %v1579_v1 = vpop.eup %1578 }
 0x4cf   :  { %v1230_v63 = vpop.xlane.xlu0 %1229 }
 0x4d0   :  { %v1231_v0 = vadd.f32 %v1230_v63, %v1219_v21 }
 0x4d2   :  { %1233 = vst.msk [vmem:[#allocation3] sm:$0xff] %vm44_vm0, %v1231_v0 }
 0x4d9   :  { %v1244_v28 = vld [vmem:[#allocation3] sm:$0xff] }
 0x4da   :  { %v1245_v2 = vadd.f32 %v1579_v1, %v1244_v28 }
 0x4dc   :  { %1248 = vperm.xlu1 %1543, %v1245_v2  }
 0x4e0   :  { %1189 = vperm.xlu1 %1543, %v1577_v8  }
 0x4fb   :  { %v622_v13 = vpop.f32.mrb[8].mxu0 }
 0x4fc   :  { %v1434_v9 = vpop.f32.mrb[9].mxu0 }
 0x4ff   :  { %v702_v37 = vpop.f32.mrb[8].mxu1 }
 0x500   :  { %v1201_v3 = vrot.slane %v702_v37, 7  ;;  %v1439_v4 = vpop.f32.mrb[9].mxu1 }
 0x502   :  { %v1202_v5 = vsel %vm382_vm1, %v1201_v3, %v622_v13 }
 0x503   :  { %v782_v25 = vpop.f32.mrb[10].mxu0 }
 0x504   :  { %v1203_v34 = vrot.slane %v782_v25, 6  ;;  %v1444_v6 = vpop.f32.mrb[11].mxu0 }
 0x506   :  { %v1204_v30 = vsel %vm384_vm2, %v1203_v34, %v1202_v5 }
 0x507   :  { %v862_v7 = vpop.f32.mrb[10].mxu1 }
 0x508   :  { %v1205_v10 = vrot.slane %v862_v7, 5  ;;  %v1449_v11 = vpop.f32.mrb[11].mxu1 }
 0x50a   :  { %v1206_v12 = vsel %vm386_vm3, %v1205_v10, %v1204_v30 }
 0x50b   :  { %v942_v14 = vpop.f32.mrb[12].mxu0 }
 0x50c   :  { %v1207_v32 = vrot.slane %v942_v14, 4  ;;  %v1454_v15 = vpop.f32.mrb[13].mxu0 }
 0x50e   :  { %v1208_v35 = vsel %vm388_vm4, %v1207_v32, %v1206_v12 }
 0x50f   :  { %v1022_v16 = vpop.f32.mrb[12].mxu1  ;;  %v1102_v17 = vpop.f32.mrb[14].mxu0 }
 0x510   :  { %v1209_v18 = vrot.slane %v1022_v16, 3  ;;  %v1211_v19 = vrot.slane %v1102_v17, 2  ;;  %v1459_v20 = vpop.f32.mrb[13].mxu1  ;;  %v1464_v22 = vpop.f32.mrb[15].mxu0 }
 0x512   :  { %v1210_v23 = vsel %vm390_vm5, %v1209_v18, %v1208_v35 }
 0x513   :  { %v1182_v26 = vpop.f32.mrb[14].mxu1  ;;  %v1212_v27 = vsel %vm392_vm6, %v1211_v19, %v1210_v23 }
 0x514   :  { %v1213_v29 = vrot.slane %v1182_v26, 1  ;;  %v1469_v31 = vpop.f32.mrb[15].mxu1 }
 0x516   :  { %v1214_v33 = vsel %vm394_vm7, %v1213_v29, %v1212_v27 }
 0x55b   :  { %v1249_v36 = vpop.permute.xlu1 %1248 }
 0x55c   :  { %1580 = vrcp.f32 %v1249_v36 }
 0x55f   :  { %v1190_v44 = vpop.permute.xlu1 %1189 }
 0x560   :  { %v1192_v45 = vmul.f32 0.0, %v1190_v44 }
 0x562   :  { %v1216_v38 = vadd.f32 %v1214_v33, %v1192_v45 }
 0x566   :  { %v1581_v47 = vpop.eup %1580 }
 0x567   :  { %v1252_v39 = vmul.f32 %v1581_v47, %v1216_v38 }
 0x569   :  { %1253 = vst [vmem:[#allocation9] sm:$0xff] %v1252_v39 }
 0x56a   :  { %1615 = shalt.err (!%p1612_p12)
}
 0x56b   :  { %s1616_s30 = scalar_lea.hbm %s1973_s6, 128 }
 0x56c   :  { %p1617_p13 = scmp.ne.s32.totalorder %s1973_s6, %s1616_s30  ;;  %p1620_p0 = scmp.lt.u32.totalorder %s1616_s30, %s1973_s6 }
 0x56e   :  { %p1622_p1 = pnand %p1620_p0, %p1617_p13 }
 0x570   :  { %1625 = shalt.err (!%p1622_p1)
}
 0x571   :  { %1263 = dma.vmem_to_hbm [thread:$0]  %s1261_s26, 128, %s1973_s6, [#allocation8]  }
 0x572   :  { %1628 = dma.done.wait [#allocation8], 128  }
 0x573   :  { %1629 = vsyncadd [#allocation8], 4294967168 }
 0x574   :  { %1267 = vsyncpa [#allocation7], 1 }
 0x575   :  { %1268 = vsyncpa [#allocation8], 1 }

</bundles_post_ra>
